<compile_context>
chip_gen: v6e
topology: v6e:2x2x1
jax: 0.10.0
libtpu: 0.0.40
codegen_flags: <defaults>
</compile_context>

<pallas_src>
import functools
import math

import jax
import jax.numpy as jnp
from jax.experimental import pallas as pl
from jax.experimental.pallas import tpu as pltpu


def _cpm_kernel(d_out,
                xi_ref, xt_ref, conj_ref,
                wi1_ref, bi1_ref, wi2_ref, bi2_ref,
                wt1_ref, bt1_ref, wt2_ref, bt2_ref,
                cat_ref, x1_ref, x2_ref):
    mm_dtype = wi1_ref.dtype            # f32 or bf16 (chosen in prepare_params)

    xi = xi_ref[...].astype(mm_dtype)   # (TB, Di)
    xt = xt_ref[...].astype(mm_dtype)   # (TB, Dt)
    conj = conj_ref[...]                # (TB, 1), f32

    # Image branch: (BN folded into W_i1/b_i1) -> [Dropout = identity] -> ReLU -> Linear.
    h_i = jnp.dot(xi, wi1_ref[...], preferred_element_type=jnp.float32) + bi1_ref[...]
    h_i = jnp.maximum(h_i, 0.0)
    x1 = jnp.dot(h_i.astype(mm_dtype), wi2_ref[...],
                 preferred_element_type=jnp.float32) + bi2_ref[...]

    # Text (bert) branch: (BN folded into W_t1/b_t1) -> Linear -> ReLU -> Linear.
    h_t = jnp.dot(xt, wt1_ref[...], preferred_element_type=jnp.float32) + bt1_ref[...]
    h_t = jnp.maximum(h_t, 0.0)
    x2 = jnp.dot(h_t.astype(mm_dtype), wt2_ref[...],
                 preferred_element_type=jnp.float32) + bt2_ref[...]

    # Complex mixing (all f32 elementwise math).
    re = x1 * jnp.cos(x2)
    im = x1 * (conj * jnp.sin(x2))

    # torch.cat([re, im], 1) realized as two lane-aligned slice stores.
    cat_ref[:, :d_out] = re.astype(cat_ref.dtype)
    cat_ref[:, d_out:] = im.astype(cat_ref.dtype)
    x1_ref[...] = x1.astype(x1_ref.dtype)
    x2_ref[...] = x2.astype(x2_ref.dtype)


def _round_up(n, m):
    return ((n + m - 1) // m) * m


def prepare_params(params, *, bn_eps=1e-5, matmul_dtype=jnp.float32):
    """One-time weight preparation (hoisted out of the per-call path).

    Folds eval-mode BatchNorm1d into the first Linear of each branch and
    pre-transposes all weights to (in, out) so kernel matmuls contract on the
    last dim. Weights are cast to `matmul_dtype`; biases stay f32.
    """
    f32 = jnp.float32

    def fold_bn_into_linear(gamma, beta, mean, var, W, b):
        # eval BN: y = (x - mean)/sqrt(var+eps)*gamma + beta = x*scale + shift
        # Linear(y) = y @ W.T + b  with PyTorch W laid out (out, in).
        gamma, beta = gamma.astype(f32), beta.astype(f32)
        mean, var = mean.astype(f32), var.astype(f32)
        W, b = W.astype(f32), b.astype(f32)
        scale = gamma / jnp.sqrt(var + bn_eps)          # (in,)
        shift = beta - mean * scale                     # (in,)
        w_eff = (W * scale[None, :]).T                  # (in, out): x @ w_eff
        b_eff = b + shift @ W.T                         # (out,)
        return w_eff.astype(matmul_dtype), b_eff.reshape(1, -1)

    wi1, bi1 = fold_bn_into_linear(params["bn_i_gamma"], params["bn_i_beta"],
                                   params["bn_i_mean"], params["bn_i_var"],
                                   params["W_i1"], params["b_i1"])
    wt1, bt1 = fold_bn_into_linear(params["bn_t_gamma"], params["bn_t_beta"],
                                   params["bn_t_mean"], params["bn_t_var"],
                                   params["W_t1"], params["b_t1"])
    return {
        "wi1": wi1, "bi1": bi1,
        "wi2": params["W_i2"].astype(f32).T.astype(matmul_dtype),
        "bi2": params["b_i2"].astype(f32).reshape(1, -1),
        "wt1": wt1, "bt1": bt1,
        "wt2": params["W_t2"].astype(f32).T.astype(matmul_dtype),
        "bt2": params["b_t2"].astype(f32).reshape(1, -1),
    }


def complex_projection(x_img, x_txt, conjugate, prepared):
    """Forward pass of ComplexProjectionModule (inference mode).

    x_img: (B, Di), x_txt: (B, Dt), conjugate: (N>=B, 1).
    `prepared` comes from prepare_params(). Returns the module's 6-tuple.
    """
    f32 = jnp.float32
    B, Di = x_img.shape
    Bt, Dt = x_txt.shape
    assert B == Bt
    Do = prepared["wi2"].shape[1]        # image_embed_dim

    conj = conjugate[:B].reshape(B, 1).astype(f32)

    # Pad batch only to the 8-row sublane multiple; the grid handles any
    # ragged final TB block via pl.cdiv (masked edge stores, no host jnp.pad
    # to a TB multiple).
    B8 = _round_up(B, 8)
    xi_p = x_img.astype(f32)
    xt_p = x_txt.astype(f32)
    cj_p = conj
    if B8 != B:
        pad = ((0, B8 - B), (0, 0))
        xi_p = jnp.pad(xi_p, pad)
        xt_p = jnp.pad(xt_p, pad)
        cj_p = jnp.pad(cj_p, pad)

    # Batch tile: big enough to amortize per-step overhead and fill the
    # 256-row MXU (v6e/v7x), small enough to stay well inside VMEM on v7x.
    TB = min(256, B8)
    n_blocks = pl.cdiv(B8, TB)

    def row_spec(cols):
        return pl.BlockSpec((TB, cols), lambda b: (b, 0))

    def const_spec(rows, cols):
        # Constant across the grid -> no double buffering needed.
        return pl.BlockSpec((rows, cols), lambda b: (0, 0),
                            pipeline_mode=pl.Buffered(1))

    out_shapes = (
        jax.ShapeDtypeStruct((B8, 2 * Do), f32),    # concat_x = [re | im]
        jax.ShapeDtypeStruct((B8, Do), f32),        # x1
        jax.ShapeDtypeStruct((B8, Do), f32),        # x2
    )

    cat, x1, x2 = pl.pallas_call(
        functools.partial(_cpm_kernel, Do),
        out_shape=out_shapes,
        grid_spec=pltpu.PrefetchScalarGridSpec(
            num_scalar_prefetch=0,
            grid=(n_blocks,),
            in_specs=[
                row_spec(Di), row_spec(Dt), row_spec(1),
                const_spec(Di, Do), const_spec(1, Do),   # W_i1 (BN folded), b_i1
                const_spec(Do, Do), const_spec(1, Do),   # W_i2, b_i2
                const_spec(Dt, Do), const_spec(1, Do),   # W_t1 (BN folded), b_t1
                const_spec(Do, Do), const_spec(1, Do),   # W_t2, b_t2
            ],
            out_specs=[
                row_spec(2 * Do), row_spec(Do), row_spec(Do),
            ],
        ),
        compiler_params=pltpu.CompilerParams(
            dimension_semantics=("parallel",),
            vmem_limit_bytes=48 * 1024 * 1024),
    )(xi_p, xt_p, cj_p,
      prepared["wi1"], prepared["bi1"], prepared["wi2"], prepared["bi2"],
      prepared["wt1"], prepared["bt1"], prepared["wt2"], prepared["bt2"])

    cat, x1, x2 = cat[:B], x1[:B], x2[:B]
    # re/im are lane-aligned halves of cat: free slices, no duplicate stores.
    re = cat[:, :Do]
    im = cat[:, Do:]
    # unsqueeze(1) views + x[0] pass-through are free reshapes outside the kernel.
    return (cat,
            x1[:, None, :],
            x2[:, None, :],
            x_img.astype(f32)[:, None, :],
            re[:, None, :],
            im[:, None, :])


def _reference(x_img, x_txt, conjugate, params, bn_eps=1e-5):
    """Pure-JAX reference reproducing the PyTorch forward (eval mode)."""
    hp = jax.lax.Precision.HIGHEST

    def bn(x, gamma, beta, mean, var):
        return (x - mean) / jnp.sqrt(var + bn_eps) * gamma + beta

    def lin(x, W, b):
        return jnp.dot(x, W.T, precision=hp) + b

    xi = bn(x_img, params["bn_i_gamma"], params["bn_i_beta"],
            params["bn_i_mean"], params["bn_i_var"])
    h = jax.nn.relu(lin(xi, params["W_i1"], params["b_i1"]))   # dropout: identity (eval)
    x1 = lin(h, params["W_i2"], params["b_i2"])

    xt = bn(x_txt, params["bn_t_gamma"], params["bn_t_beta"],
            params["bn_t_mean"], params["bn_t_var"])
    h = jax.nn.relu(lin(xt, params["W_t1"], params["b_t1"]))
    x2 = lin(h, params["W_t2"], params["b_t2"])

    conj = conjugate[:x_img.shape[0]].reshape(-1, 1)
    re = x1 * jnp.cos(x2)
    im = x1 * (conj * jnp.sin(x2))
    cat = jnp.concatenate([re, im], axis=1)
    return (cat, x1[:, None, :], x2[:, None, :],
            x_img[:, None, :], re[:, None, :], im[:, None, :])


if __name__ == "__main__":
    # Small shapes consistent with the module (defaults are 512/512).
    B, D_IMG, D_TXT = 8, 128, 128

    key = jax.random.PRNGKey(0)
    ks = iter(jax.random.split(key, 24))

    def linear_init(k, out_dim, in_dim):
        k1, k2 = jax.random.split(k)
        bound = 1.0 / math.sqrt(in_dim)
        W = jax.random.uniform(k1, (out_dim, in_dim), jnp.float32, -bound, bound)
        b = jax.random.uniform(k2, (out_dim,), jnp.float32, -bound, bound)
        return W, b

    params = {}
    params["W_i1"], params["b_i1"] = linear_init(next(ks), D_IMG, D_IMG)
    params["W_i2"], params["b_i2"] = linear_init(next(ks), D_IMG, D_IMG)
    params["W_t1"], params["b_t1"] = linear_init(next(ks), D_IMG, D_TXT)
    params["W_t2"], params["b_t2"] = linear_init(next(ks), D_IMG, D_IMG)
    # BatchNorm1d inference-mode affine + running stats.
    params["bn_i_gamma"] = jax.random.uniform(next(ks), (D_IMG,), jnp.float32, 0.5, 1.5)
    params["bn_i_beta"] = jax.random.uniform(next(ks), (D_IMG,), jnp.float32, -0.1, 0.1)
    params["bn_i_mean"] = jax.random.uniform(next(ks), (D_IMG,), jnp.float32, -0.1, 0.1)
    params["bn_i_var"] = jax.random.uniform(next(ks), (D_IMG,), jnp.float32, 0.5, 1.5)
    params["bn_t_gamma"] = jax.random.uniform(next(ks), (D_TXT,), jnp.float32, 0.5, 1.5)
    params["bn_t_beta"] = jax.random.uniform(next(ks), (D_TXT,), jnp.float32, -0.1, 0.1)
    params["bn_t_mean"] = jax.random.uniform(next(ks), (D_TXT,), jnp.float32, -0.1, 0.1)
    params["bn_t_var"] = jax.random.uniform(next(ks), (D_TXT,), jnp.float32, 0.5, 1.5)

    x_img = jax.random.normal(next(ks), (B, D_IMG), jnp.float32)
    x_txt = jax.random.normal(next(ks), (B, D_TXT), jnp.float32)
    # CONJUGATE as used upstream: an (N, 1) +/-1 tensor sliced to the batch.
    conjugate = -jnp.ones((16, 1), jnp.float32)

    refs = _reference(x_img, x_txt, conjugate, params)
    names = ("concat_x", "x1", "x2", "x0copy", "re_score", "im_score")

    fwd = jax.jit(complex_projection)

    # f32 matmul path (tight tolerance) and bf16 matmul path (recommended on
    # v6e/v7x; f32 MXU accumulation, looser tolerance vs f32-HIGHEST ref).
    for mm_dtype, tol in ((jnp.float32, 5e-4), (jnp.bfloat16, 3e-2)):
        prepared = prepare_params(params, matmul_dtype=mm_dtype)
        outs = jax.block_until_ready(fwd(x_img, x_txt, conjugate, prepared))
        for name, o, r in zip(names, outs, refs):
            assert o.shape == r.shape, (name, o.shape, r.shape)
            assert jnp.allclose(o, r, atol=tol, rtol=tol), \
                f"mismatch vs reference ({mm_dtype.__name__}): {name}"

    print("KERNEL_OK")
</pallas_src>

<mosaic_0001>
module attributes {stable_mosaic.version = 11 : i64} {
  func.func @_cpm_kernel(%arg0: i32, %arg1: memref<8x128xf32, #tpu.memory_space<vmem>>, %arg2: memref<8x128xf32, #tpu.memory_space<vmem>>, %arg3: memref<8x1xf32, #tpu.memory_space<vmem>>, %arg4: memref<128x128xf32, #tpu.memory_space<vmem>>, %arg5: memref<1x128xf32, #tpu.memory_space<vmem>>, %arg6: memref<128x128xf32, #tpu.memory_space<vmem>>, %arg7: memref<1x128xf32, #tpu.memory_space<vmem>>, %arg8: memref<128x128xf32, #tpu.memory_space<vmem>>, %arg9: memref<1x128xf32, #tpu.memory_space<vmem>>, %arg10: memref<128x128xf32, #tpu.memory_space<vmem>>, %arg11: memref<1x128xf32, #tpu.memory_space<vmem>>, %arg12: memref<8x256xf32, #tpu.memory_space<vmem>>, %arg13: memref<8x128xf32, #tpu.memory_space<vmem>>, %arg14: memref<8x128xf32, #tpu.memory_space<vmem>>) attributes {dimension_semantics = [#tpu.dimension_semantics<parallel>], iteration_bounds = array<i64: 1>, scalar_prefetch = 0 : i64, scratch_operands = 0 : i64, tpu.core_type = #tpu.core_type<tc>, window_params = [{transform_indices = @transform_0, window_bounds = array<i64: 8, 128>}, {transform_indices = @transform_1, window_bounds = array<i64: 8, 128>}, {transform_indices = @transform_2, window_bounds = array<i64: 8, 1>}, {pipeline_mode = #tpu.pipeline_mode<synchronous>, transform_indices = @transform_3, window_bounds = array<i64: 128, 128>}, {pipeline_mode = #tpu.pipeline_mode<synchronous>, transform_indices = @transform_4, window_bounds = array<i64: 1, 128>}, {pipeline_mode = #tpu.pipeline_mode<synchronous>, transform_indices = @transform_5, window_bounds = array<i64: 128, 128>}, {pipeline_mode = #tpu.pipeline_mode<synchronous>, transform_indices = @transform_6, window_bounds = array<i64: 1, 128>}, {pipeline_mode = #tpu.pipeline_mode<synchronous>, transform_indices = @transform_7, window_bounds = array<i64: 128, 128>}, {pipeline_mode = #tpu.pipeline_mode<synchronous>, transform_indices = @transform_8, window_bounds = array<i64: 1, 128>}, {pipeline_mode = #tpu.pipeline_mode<synchronous>, transform_indices = @transform_9, window_bounds = array<i64: 128, 128>}, {pipeline_mode = #tpu.pipeline_mode<synchronous>, transform_indices = @transform_10, window_bounds = array<i64: 1, 128>}, {transform_indices = @transform_11, window_bounds = array<i64: 8, 256>}, {transform_indices = @transform_12, window_bounds = array<i64: 8, 128>}, {transform_indices = @transform_13, window_bounds = array<i64: 8, 128>}]} {
    %c0 = arith.constant 0 : index
    %c0_0 = arith.constant 0 : index
    %0 = vector.load %arg1[%c0, %c0_0] : memref<8x128xf32, #tpu.memory_space<vmem>>, vector<8x128xf32>
    %c0_1 = arith.constant 0 : index
    %c0_2 = arith.constant 0 : index
    %1 = vector.load %arg2[%c0_1, %c0_2] : memref<8x128xf32, #tpu.memory_space<vmem>>, vector<8x128xf32>
    %c0_3 = arith.constant 0 : index
    %c0_4 = arith.constant 0 : index
    %2 = vector.load %arg3[%c0_3, %c0_4] : memref<8x1xf32, #tpu.memory_space<vmem>>, vector<8x1xf32>
    %c0_5 = arith.constant 0 : index
    %c0_6 = arith.constant 0 : index
    %3 = vector.load %arg4[%c0_5, %c0_6] : memref<128x128xf32, #tpu.memory_space<vmem>>, vector<128x128xf32>
    %cst = arith.constant dense<0.000000e+00> : vector<8x128xf32>
    %4 = tpu.matmul %0, %3, %cst {dimension_numbers = #tpu.dot_dimension_numbers<[1], [0], [0], [1], [0, 0, 1, 1], [], []>} : vector<8x128xf32>, vector<128x128xf32>, vector<8x128xf32> -> vector<8x128xf32>
    %c0_7 = arith.constant 0 : index
    %c0_8 = arith.constant 0 : index
    %5 = vector.load %arg5[%c0_7, %c0_8] : memref<1x128xf32, #tpu.memory_space<vmem>>, vector<1x128xf32>
    %6 = vector.broadcast %5 : vector<1x128xf32> to vector<8x128xf32>
    %7 = arith.addf %4, %6 : vector<8x128xf32>
    %cst_9 = arith.constant 0.000000e+00 : f32
    %8 = vector.broadcast %cst_9 : f32 to vector<8x128xf32>
    %9 = arith.maximumf %7, %8 : vector<8x128xf32>
    %c0_10 = arith.constant 0 : index
    %c0_11 = arith.constant 0 : index
    %10 = vector.load %arg6[%c0_10, %c0_11] : memref<128x128xf32, #tpu.memory_space<vmem>>, vector<128x128xf32>
    %cst_12 = arith.constant dense<0.000000e+00> : vector<8x128xf32>
    %11 = tpu.matmul %9, %10, %cst_12 {dimension_numbers = #tpu.dot_dimension_numbers<[1], [0], [0], [1], [0, 0, 1, 1], [], []>} : vector<8x128xf32>, vector<128x128xf32>, vector<8x128xf32> -> vector<8x128xf32>
    %c0_13 = arith.constant 0 : index
    %c0_14 = arith.constant 0 : index
    %12 = vector.load %arg7[%c0_13, %c0_14] : memref<1x128xf32, #tpu.memory_space<vmem>>, vector<1x128xf32>
    %13 = vector.broadcast %12 : vector<1x128xf32> to vector<8x128xf32>
    %14 = arith.addf %11, %13 : vector<8x128xf32>
    %c0_15 = arith.constant 0 : index
    %c0_16 = arith.constant 0 : index
    %15 = vector.load %arg8[%c0_15, %c0_16] : memref<128x128xf32, #tpu.memory_space<vmem>>, vector<128x128xf32>
    %cst_17 = arith.constant dense<0.000000e+00> : vector<8x128xf32>
    %16 = tpu.matmul %1, %15, %cst_17 {dimension_numbers = #tpu.dot_dimension_numbers<[1], [0], [0], [1], [0, 0, 1, 1], [], []>} : vector<8x128xf32>, vector<128x128xf32>, vector<8x128xf32> -> vector<8x128xf32>
    %c0_18 = arith.constant 0 : index
    %c0_19 = arith.constant 0 : index
    %17 = vector.load %arg9[%c0_18, %c0_19] : memref<1x128xf32, #tpu.memory_space<vmem>>, vector<1x128xf32>
    %18 = vector.broadcast %17 : vector<1x128xf32> to vector<8x128xf32>
    %19 = arith.addf %16, %18 : vector<8x128xf32>
    %cst_20 = arith.constant 0.000000e+00 : f32
    %20 = vector.broadcast %cst_20 : f32 to vector<8x128xf32>
    %21 = arith.maximumf %19, %20 : vector<8x128xf32>
    %c0_21 = arith.constant 0 : index
    %c0_22 = arith.constant 0 : index
    %22 = vector.load %arg10[%c0_21, %c0_22] : memref<128x128xf32, #tpu.memory_space<vmem>>, vector<128x128xf32>
    %cst_23 = arith.constant dense<0.000000e+00> : vector<8x128xf32>
    %23 = tpu.matmul %21, %22, %cst_23 {dimension_numbers = #tpu.dot_dimension_numbers<[1], [0], [0], [1], [0, 0, 1, 1], [], []>} : vector<8x128xf32>, vector<128x128xf32>, vector<8x128xf32> -> vector<8x128xf32>
    %c0_24 = arith.constant 0 : index
    %c0_25 = arith.constant 0 : index
    %24 = vector.load %arg11[%c0_24, %c0_25] : memref<1x128xf32, #tpu.memory_space<vmem>>, vector<1x128xf32>
    %25 = vector.broadcast %24 : vector<1x128xf32> to vector<8x128xf32>
    %26 = arith.addf %23, %25 : vector<8x128xf32>
    %27 = math.cos %26 : vector<8x128xf32>
    %28 = arith.mulf %14, %27 : vector<8x128xf32>
    %29 = math.sin %26 : vector<8x128xf32>
    %30 = vector.broadcast %2 : vector<8x1xf32> to vector<8x128xf32>
    %31 = arith.mulf %30, %29 : vector<8x128xf32>
    %32 = arith.mulf %14, %31 : vector<8x128xf32>
    %c0_26 = arith.constant 0 : index
    %c0_27 = arith.constant 0 : index
    %33 = vector.load %arg12[%c0_26, %c0_27] : memref<8x256xf32, #tpu.memory_space<vmem>>, vector<8x128xf32>
    tpu.vector_store %arg12[%c0_26, %c0_27], %28 {strides = array<i32>} : memref<8x256xf32, #tpu.memory_space<vmem>>, vector<8x128xf32>,
    %c0_28 = arith.constant 0 : index
    %c128 = arith.constant 128 : index
    %34 = vector.load %arg12[%c0_28, %c128] : memref<8x256xf32, #tpu.memory_space<vmem>>, vector<8x128xf32>
    tpu.vector_store %arg12[%c0_28, %c128], %32 {strides = array<i32>} : memref<8x256xf32, #tpu.memory_space<vmem>>, vector<8x128xf32>,
    %c0_29 = arith.constant 0 : index
    %c0_30 = arith.constant 0 : index
    %35 = vector.load %arg13[%c0_29, %c0_30] : memref<8x128xf32, #tpu.memory_space<vmem>>, vector<8x128xf32>
    tpu.vector_store %arg13[%c0_29, %c0_30], %14 {strides = array<i32>} : memref<8x128xf32, #tpu.memory_space<vmem>>, vector<8x128xf32>,
    %c0_31 = arith.constant 0 : index
    %c0_32 = arith.constant 0 : index
    %36 = vector.load %arg14[%c0_31, %c0_32] : memref<8x128xf32, #tpu.memory_space<vmem>>, vector<8x128xf32>
    tpu.vector_store %arg14[%c0_31, %c0_32], %26 {strides = array<i32>} : memref<8x128xf32, #tpu.memory_space<vmem>>, vector<8x128xf32>,
    return
  }
  func.func @transform_0(%arg0: i32) -> (i32, i32) {
    %c0_i32 = arith.constant 0 : i32
    %c0_i32_0 = arith.constant 0 : i32
    return %arg0, %c0_i32 : i32, i32
  }
  func.func @transform_1(%arg0: i32) -> (i32, i32) {
    %c0_i32 = arith.constant 0 : i32
    %c0_i32_0 = arith.constant 0 : i32
    return %arg0, %c0_i32 : i32, i32
  }
  func.func @transform_2(%arg0: i32) -> (i32, i32) {
    %c0_i32 = arith.constant 0 : i32
    %c0_i32_0 = arith.constant 0 : i32
    return %arg0, %c0_i32 : i32, i32
  }
  func.func @transform_3(%arg0: i32) -> (i32, i32) {
    %c0_i32 = arith.constant 0 : i32
    %c0_i32_0 = arith.constant 0 : i32
    %c0_i32_1 = arith.constant 0 : i32
    return %c0_i32, %c0_i32_0 : i32, i32
  }
  func.func @transform_4(%arg0: i32) -> (i32, i32) {
    %c0_i32 = arith.constant 0 : i32
    %c0_i32_0 = arith.constant 0 : i32
    %c0_i32_1 = arith.constant 0 : i32
    return %c0_i32, %c0_i32_0 : i32, i32
  }
  func.func @transform_5(%arg0: i32) -> (i32, i32) {
    %c0_i32 = arith.constant 0 : i32
    %c0_i32_0 = arith.constant 0 : i32
    %c0_i32_1 = arith.constant 0 : i32
    return %c0_i32, %c0_i32_0 : i32, i32
  }
  func.func @transform_6(%arg0: i32) -> (i32, i32) {
    %c0_i32 = arith.constant 0 : i32
    %c0_i32_0 = arith.constant 0 : i32
    %c0_i32_1 = arith.constant 0 : i32
    return %c0_i32, %c0_i32_0 : i32, i32
  }
  func.func @transform_7(%arg0: i32) -> (i32, i32) {
    %c0_i32 = arith.constant 0 : i32
    %c0_i32_0 = arith.constant 0 : i32
    %c0_i32_1 = arith.constant 0 : i32
    return %c0_i32, %c0_i32_0 : i32, i32
  }
  func.func @transform_8(%arg0: i32) -> (i32, i32) {
    %c0_i32 = arith.constant 0 : i32
    %c0_i32_0 = arith.constant 0 : i32
    %c0_i32_1 = arith.constant 0 : i32
    return %c0_i32, %c0_i32_0 : i32, i32
  }
  func.func @transform_9(%arg0: i32) -> (i32, i32) {
    %c0_i32 = arith.constant 0 : i32
    %c0_i32_0 = arith.constant 0 : i32
    %c0_i32_1 = arith.constant 0 : i32
    return %c0_i32, %c0_i32_0 : i32, i32
  }
  func.func @transform_10(%arg0: i32) -> (i32, i32) {
    %c0_i32 = arith.constant 0 : i32
    %c0_i32_0 = arith.constant 0 : i32
    %c0_i32_1 = arith.constant 0 : i32
    return %c0_i32, %c0_i32_0 : i32, i32
  }
  func.func @transform_11(%arg0: i32) -> (i32, i32) {
    %c0_i32 = arith.constant 0 : i32
    %c0_i32_0 = arith.constant 0 : i32
    return %arg0, %c0_i32 : i32, i32
  }
  func.func @transform_12(%arg0: i32) -> (i32, i32) {
    %c0_i32 = arith.constant 0 : i32
    %c0_i32_0 = arith.constant 0 : i32
    return %arg0, %c0_i32 : i32, i32
  }
  func.func @transform_13(%arg0: i32) -> (i32, i32) {
    %c0_i32 = arith.constant 0 : i32
    %c0_i32_0 = arith.constant 0 : i32
    return %arg0, %c0_i32 : i32, i32
  }
}

</mosaic_0001>

<bundles_post_ra>
// kernel: complex_projection.1
= control target key start
LH: loop header
LB: loop body
LE: loop exit
PB: predicated region body
PF: predicated region fallthrough
CT: control target
= control target key end

     0   :  { %19 = vsyncpa [#allocation3], 0  ;;  %s1381_s0 = inlined_call_operand.vmem [shape: f32[8,128], index: 0, kind: input, shape index: {}]   ;;  %s1382_s1 = inlined_call_operand.vmem [shape: f32[8,128], index: 1, kind: input, shape index: {}]   ;;  %s1383_s2 = inlined_call_operand.vmem [shape: f32[8,1], index: 2, kind: input, shape index: {}]   ;;  %s1384_s3 = inlined_call_operand.hbm [shape: f32[128,128], index: 3, kind: input, shape index: {}]   ;;  %s1385_s4 = inlined_call_operand.hbm [shape: f32[1,128], index: 4, kind: input, shape index: {}]   ;;  %s1386_s5 = inlined_call_operand.hbm [shape: f32[128,128], index: 5, kind: input, shape index: {}]   ;;  %s1387_s6 = inlined_call_operand.vmem [shape: f32[1,128], index: 6, kind: input, shape index: {}]   ;;  %s1388_s7 = inlined_call_operand.hbm [shape: f32[128,128], index: 7, kind: input, shape index: {}]   ;;  %s1389_s8 = inlined_call_operand.vmem [shape: f32[1,128], index: 8, kind: input, shape index: {}]   ;;  %s1390_s9 = inlined_call_operand.hbm [shape: f32[128,128], index: 9, kind: input, shape index: {}]   ;;  %s1391_s10 = inlined_call_operand.vmem [shape: f32[1,128], index: 10, kind: input, shape index: {}]   ;;  %s1392_s11 = inlined_call_operand.vmem [shape: f32[8,256], index: 11, kind: output, shape index: {0}]   ;;  %s1393_s12 = inlined_call_operand.hbm [shape: f32[8,128], index: 12, kind: output, shape index: {1}]   ;;  %s1394_s13 = inlined_call_operand.hbm [shape: f32[8,128], index: 13, kind: output, shape index: {2}]  }
   0x1   :  { %20 = vsyncpa [#allocation6], 0 }
   0x2   :  { %21 = vsyncpa [#allocation9], 0 }
   0x3   :  { %22 = vsyncpa [#allocation4], 0 }
   0x4   :  { %23 = vsyncpa [#allocation13], 0  ;;  %s1137_s25 = smov [#allocation5]  }
   0x5   :  { %s48_s26 = sshll.u32 %s1137_s25, 4  ;;  %s49_s26 = int_to_ptr.vmem [resolvable:$true] %s48_s26 }
   0x6   :  { %s995_s27 = scalar_lea.vmem %s49_s26, 16  ;;  %s999_s28 = scalar_lea.vmem %s49_s26, 32 }
   0x7   :  { %p996_p0 = scmp.ne.s32.totalorder %s49_s26, %s995_s27  ;;  %p1000_p1 = scmp.lt.s32.totalorder %s49_s26, %s49_s26 }
   0x8   :  { %p1001_p2 = scmp.lt.s32.totalorder %s999_s28, %s995_s27 }
   0xa   :  { %p1002_p3 = por %p1001_p2, %p1000_p1 }
   0xc   :  { %p1003_p4 = pnand %p1002_p3, %p996_p0 }
   0xe   :  { %1006 = shalt.err (!%p1003_p4)
}
   0xf   :  { %51 = dma.hbm_to_vmem [thread:$0]  %s1385_s4, 16, %s49_s26, [#allocation6]  }
  0x10   :  { %s1138_s14 = smov [#allocation8]   ;;  %s1139_s16 = smov [#allocation2]  }
  0x11   :  { %s71_s15 = sshll.u32 %s1138_s14, 4  ;;  %s35_s17 = sshll.u32 %s1139_s16, 4  ;;  %s72_s15 = int_to_ptr.vmem [resolvable:$true] %s71_s15  ;;  %s36_s17 = int_to_ptr.vmem [resolvable:$true] %s35_s17 }
  0x12   :  { %s1015_s18 = scalar_lea.vmem %s72_s15, 2048  ;;  %p1020_p6 = scmp.lt.s32.totalorder %s72_s15, %s72_s15 }
  0x13   :  { %p1016_p5 = scmp.ne.s32.totalorder %s72_s15, %s1015_s18  ;;  %p1021_p7 = scmp.lt.s32.totalorder %s1015_s18, %s1015_s18 }
  0x15   :  { %p1022_p8 = por %p1021_p7, %p1020_p6 }
  0x17   :  { %p1023_p9 = pnand %p1022_p8, %p1016_p5 }
  0x19   :  { %1026 = shalt.err (!%p1023_p9)
}
  0x1a   :  { %s1140_s19 = smov 128   ;;  %s1141_s20 = smov 8  }
  0x1b   :  { %77 = dma.hbm_to_vmem [thread:$0]  %s1388_s7, 2048, %s72_s15, [#allocation9], %s1140_s19, %s1140_s19, %s1141_s20  }
  0x1c   :  { %s1035_s4 = scalar_lea.vmem %s36_s17, 2048  ;;  %p1040_p11 = scmp.lt.s32.totalorder %s36_s17, %s36_s17 }
  0x1d   :  { %p1036_p10 = scmp.ne.s32.totalorder %s36_s17, %s1035_s4  ;;  %p1041_p12 = scmp.lt.s32.totalorder %s1035_s4, %s1035_s4 }
  0x1f   :  { %p1042_p13 = por %p1041_p12, %p1040_p11 }
  0x21   :  { %p1043_p0 = pnand %p1042_p13, %p1036_p10 }
  0x23   :  { %1046 = shalt.err (!%p1043_p0)
}
  0x24   :  { %41 = dma.hbm_to_vmem [thread:$0]  %s1384_s3, 2048, %s36_s17, [#allocation3], %s1140_s19, %s1140_s19, %s1141_s20  }
  0x25   :  { %s1142_s25 = smov [#allocation7]   ;;  %s1143_s27 = smov [#allocation10]  }
  0x26   :  { %s57_s26 = sshll.u32 %s1142_s25, 4  ;;  %s85_s7 = sshll.u32 %s1143_s27, 4  ;;  %s58_s26 = int_to_ptr.vmem [resolvable:$true] %s57_s26  ;;  %s86_s7 = int_to_ptr.vmem [resolvable:$true] %s85_s7 }
  0x27   :  { %s1055_s28 = scalar_lea.vmem %s58_s26, 2048  ;;  %p1060_p2 = scmp.lt.s32.totalorder %s58_s26, %s58_s26 }
  0x28   :  { %p1056_p1 = scmp.ne.s32.totalorder %s58_s26, %s1055_s28  ;;  %p1061_p3 = scmp.lt.s32.totalorder %s1055_s28, %s1055_s28 }
  0x2a   :  { %p1062_p4 = por %p1061_p3, %p1060_p2 }
  0x2c   :  { %p1063_p5 = pnand %p1062_p4, %p1056_p1 }
  0x2e   :  { %1066 = shalt.err (!%p1063_p5)
}
  0x2f   :  { %63 = dma.hbm_to_vmem [thread:$0]  %s1386_s5, 2048, %s58_s26, [#allocation6], %s1140_s19, %s1140_s19, %s1141_s20  }
  0x30   :  { %s1075_s3 = scalar_lea.vmem %s86_s7, 2048  ;;  %p1080_p7 = scmp.lt.s32.totalorder %s86_s7, %s86_s7 }
  0x31   :  { %p1076_p6 = scmp.ne.s32.totalorder %s86_s7, %s1075_s3  ;;  %p1081_p8 = scmp.lt.s32.totalorder %s1075_s3, %s1075_s3 }
  0x33   :  { %p1082_p9 = por %p1081_p8, %p1080_p7 }
  0x35   :  { %p1083_p10 = pnand %p1082_p9, %p1076_p6 }
  0x37   :  { %1086 = shalt.err (!%p1083_p10)
}
  0x38   :  { %91 = dma.hbm_to_vmem [thread:$0]  %s1390_s9, 2048, %s86_s7, [#allocation9], %s1140_s19, %s1140_s19, %s1141_s20  }
  0x39   :  { %1127 = dma.done.wait [#allocation3], 2048  }
  0x3a   :  { %1128 = vsyncadd [#allocation3], 4294965248 }
  0x3b   :  { %1129 = dma.done.wait [#allocation6], 2064  }
  0x3c   :  { %1130 = vsyncadd [#allocation6], 4294965232 }
  0x3d   :  { %1131 = dma.done.wait [#allocation9], 4096  }
  0x3e   :  { %1132 = vsyncadd [#allocation9], 4294963200  ;;  %v1144_v0 = vmov 0.0   ;;  %vm1145_vm0 = vmmov 0   ;;  %v127_v1 = vld [vmem:[#allocation2 + $0x78] sm:$0xff]  ;;  %v126_v2 = vld [vmem:[#allocation2 + $0x70] sm:$0xff] }
  0x3f   :  { %820 = vmatprep.subr.mxu0 %v1144_v0  ;;  %852 = vmatprep.mubr.msk.f32.mxu0 %vm1145_vm0, %v1144_v0  ;;  %v125_v3 = vld [vmem:[#allocation2 + $0x68] sm:$0xff]  ;;  %v124_v4 = vld [vmem:[#allocation2 + $0x60] sm:$0xff]  ;;  %v123_v5 = vld [vmem:[#allocation2 + $0x58] sm:$0xff]  ;;  %v1146_v52 = vmov 0  }
  0x40   :  { %855 = vmatprep.subr.mxu1 %v1144_v0  ;;  %887 = vmatprep.mubr.msk.f32.mxu1 %vm1145_vm0, %v1144_v0  ;;  %v122_v6 = vld [vmem:[#allocation2 + $0x50] sm:$0xff]  ;;  %v121_v7 = vld [vmem:[#allocation2 + $0x48] sm:$0xff]  ;;  %v221_v8 = vld [vmem:[#allocation7 + $0x78] sm:$0xff] }
  0x41   :  { %821 = vmatpush3.msra.mxu0 %v127_v1  ;;  %v220_v9 = vld [vmem:[#allocation7 + $0x70] sm:$0xff]  ;;  %v120_v10 = vld [vmem:[#allocation2 + $0x40] sm:$0xff]  ;;  %856 = vmatpush3.msra.mxu1 %v221_v8  ;;  %v219_v11 = vld [vmem:[#allocation7 + $0x68] sm:$0xff] }
  0x42   :  { %822 = vmatprep.subr.mxu0 %v1144_v0  ;;  %857 = vmatprep.subr.mxu1 %v1144_v0  ;;  %v119_v12 = vld [vmem:[#allocation2 + $0x38] sm:$0xff]  ;;  %v218_v13 = vld [vmem:[#allocation7 + $0x60] sm:$0xff]  ;;  %v118_v14 = vld [vmem:[#allocation2 + $0x30] sm:$0xff] }
  0x43   :  { %823 = vmatpush3.msra.mxu0 %v126_v2  ;;  %858 = vmatpush3.msra.mxu1 %v220_v9  ;;  %v217_v15 = vld [vmem:[#allocation7 + $0x58] sm:$0xff]  ;;  %v117_v16 = vld [vmem:[#allocation2 + $0x28] sm:$0xff]  ;;  %v216_v17 = vld [vmem:[#allocation7 + $0x50] sm:$0xff] }
  0x44   :  { %824 = vmatprep.subr.mxu0 %v1144_v0  ;;  %859 = vmatprep.subr.mxu1 %v1144_v0  ;;  %v116_v18 = vld [vmem:[#allocation2 + $0x20] sm:$0xff]  ;;  %v215_v19 = vld [vmem:[#allocation7 + $0x48] sm:$0xff]  ;;  %v115_v20 = vld [vmem:[#allocation2 + $0x18] sm:$0xff] }
  0x45   :  { %825 = vmatpush3.msra.mxu0 %v125_v3  ;;  %860 = vmatpush3.msra.mxu1 %v219_v11  ;;  %v214_v21 = vld [vmem:[#allocation7 + $0x40] sm:$0xff]  ;;  %v114_v22 = vld [vmem:[#allocation2 + $0x10] sm:$0xff]  ;;  %v213_v23 = vld [vmem:[#allocation7 + $0x38] sm:$0xff] }
  0x46   :  { %826 = vmatprep.subr.mxu0 %v1144_v0  ;;  %861 = vmatprep.subr.mxu1 %v1144_v0  ;;  %v113_v24 = vld [vmem:[#allocation2 + $0x8] sm:$0xff]  ;;  %v212_v25 = vld [vmem:[#allocation7 + $0x30] sm:$0xff]  ;;  %v112_v26 = vld [vmem:[#allocation2] sm:$0xff] }
  0x47   :  { %827 = vmatpush3.msra.mxu0 %v124_v4  ;;  %862 = vmatpush3.msra.mxu1 %v218_v13  ;;  %v109_v27 = vld [vmem:[%s1381_s0] sm:$0xff]  ;;  %v211_v29 = vld [vmem:[#allocation7 + $0x28] sm:$0xff]  ;;  %v313_v30 = vld [vmem:[#allocation8 + $0x70] sm:$0xff] }
  0x48   :  { %828 = vmatprep.subr.mxu0 %v1144_v0  ;;  %863 = vmatprep.subr.mxu1 %v1144_v0  ;;  %v314_v28 = vld [vmem:[#allocation8 + $0x78] sm:$0xff]  ;;  %v210_v31 = vld [vmem:[#allocation7 + $0x20] sm:$0xff]  ;;  %v312_v32 = vld [vmem:[#allocation8 + $0x68] sm:$0xff] }
  0x49   :  { %829 = vmatpush3.msra.mxu0 %v123_v5  ;;  %864 = vmatpush3.msra.mxu1 %v217_v15  ;;  %v209_v33 = vld [vmem:[#allocation7 + $0x18] sm:$0xff]  ;;  %v311_v34 = vld [vmem:[#allocation8 + $0x60] sm:$0xff]  ;;  %v309_v36 = vld [vmem:[#allocation8 + $0x50] sm:$0xff] }
  0x4a   :  { %830 = vmatprep.subr.mxu0 %v1144_v0  ;;  %865 = vmatprep.subr.mxu1 %v1144_v0  ;;  %v310_v35 = vld [vmem:[#allocation8 + $0x58] sm:$0xff]  ;;  %v308_v37 = vld [vmem:[#allocation8 + $0x48] sm:$0xff]  ;;  %v307_v38 = vld [vmem:[#allocation8 + $0x40] sm:$0xff] }
  0x4b   :  { %831 = vmatpush3.msra.mxu0 %v122_v6  ;;  %866 = vmatpush3.msra.mxu1 %v216_v17  ;;  %v306_v39 = vld [vmem:[#allocation8 + $0x38] sm:$0xff]  ;;  %v305_v40 = vld [vmem:[#allocation8 + $0x30] sm:$0xff]  ;;  %v304_v41 = vld [vmem:[#allocation8 + $0x28] sm:$0xff] }
  0x4c   :  { %832 = vmatprep.subr.mxu0 %v1144_v0  ;;  %867 = vmatprep.subr.mxu1 %v1144_v0  ;;  %v303_v42 = vld [vmem:[#allocation8 + $0x20] sm:$0xff]  ;;  %v302_v43 = vld [vmem:[#allocation8 + $0x18] sm:$0xff]  ;;  %v301_v44 = vld [vmem:[#allocation8 + $0x10] sm:$0xff] }
  0x4d   :  { %833 = vmatpush3.msra.mxu0 %v121_v7  ;;  %868 = vmatpush3.msra.mxu1 %v215_v19  ;;  %v300_v45 = vld [vmem:[#allocation8 + $0x8] sm:$0xff]  ;;  %v299_v46 = vld [vmem:[#allocation8] sm:$0xff]  ;;  %v208_v48 = vld [vmem:[#allocation7 + $0x10] sm:$0xff] }
  0x4e   :  { %834 = vmatprep.subr.mxu0 %v1144_v0  ;;  %869 = vmatprep.subr.mxu1 %v1144_v0  ;;  %v110_v47 = vld [vmem:[%s1382_s1] sm:$0xff]  ;;  %v207_v49 = vld [vmem:[#allocation7 + $0x8] sm:$0xff]  ;;  %v407_v59 = vld [vmem:[#allocation10 + $0x70] sm:$0xff] }
  0x4f   :  { %835 = vmatpush3.msra.mxu0 %v120_v10  ;;  %870 = vmatpush3.msra.mxu1 %v214_v21  ;;  %v206_v50 = vld [vmem:[#allocation7] sm:$0xff]  ;;  %v740_v53 = vld [vmem:[#allocation5] ss:$0 sm:$0xff]  ;;  %v406_v60 = vld [vmem:[#allocation10 + $0x68] sm:$0xff] }
  0x50   :  { %836 = vmatprep.subr.mxu0 %v1144_v0  ;;  %871 = vmatprep.subr.mxu1 %v1144_v0  ;;  %v111_v51 = vld [vmem:[%s1383_s2] sm:$0xff]  ;;  %v403_v63 = vld [vmem:[#allocation10 + $0x50] sm:$0xff]  ;;  %v402_v1 = vld [vmem:[#allocation10 + $0x48] sm:$0xff] }
  0x51   :  { %837 = vmatpush3.msra.mxu0 %v119_v12  ;;  %872 = vmatpush3.msra.mxu1 %v213_v23  ;;  %v408_v58 = vld [vmem:[#allocation10 + $0x78] sm:$0xff]  ;;  %v405_v61 = vld [vmem:[#allocation10 + $0x60] sm:$0xff]  ;;  %v399_v4 = vld [vmem:[#allocation10 + $0x30] sm:$0xff] }
  0x52   :  { %838 = vmatprep.subr.mxu0 %v1144_v0  ;;  %873 = vmatprep.subr.mxu1 %v1144_v0  ;;  %v404_v62 = vld [vmem:[#allocation10 + $0x58] sm:$0xff]  ;;  %v401_v2 = vld [vmem:[#allocation10 + $0x40] sm:$0xff]  ;;  %v398_v5 = vld [vmem:[#allocation10 + $0x28] sm:$0xff] }
  0x53   :  { %839 = vmatpush3.msra.mxu0 %v118_v14  ;;  %874 = vmatpush3.msra.mxu1 %v212_v25  ;;  %v400_v3 = vld [vmem:[#allocation10 + $0x38] sm:$0xff]  ;;  %v397_v6 = vld [vmem:[#allocation10 + $0x20] sm:$0xff]  ;;  %v395_v8 = vld [vmem:[#allocation10 + $0x10] sm:$0xff] }
  0x54   :  { %840 = vmatprep.subr.mxu0 %v1144_v0  ;;  %875 = vmatprep.subr.mxu1 %v1144_v0  ;;  %v396_v7 = vld [vmem:[#allocation10 + $0x18] sm:$0xff]  ;;  %v394_v10 = vld [vmem:[#allocation10 + $0x8] sm:$0xff]  ;;  %v393_v13 = vld [vmem:[#allocation10] sm:$0xff] }
  0x55   :  { %841 = vmatpush3.msra.mxu0 %v117_v16  ;;  %876 = vmatpush3.msra.mxu1 %v211_v29  ;;  %v742_v9 = vld [vmem:[%s1389_s8] ss:$0 sm:$0xff]  ;;  %s1147_s8 = smov [#allocation11]  }
  0x56   :  { %842 = vmatprep.subr.mxu0 %v1144_v0  ;;  %877 = vmatprep.subr.mxu1 %v1144_v0  ;;  %v741_v16 = vld [vmem:[%s1387_s6] ss:$0 sm:$0xff]  ;;  %s713_s21 = sshll.u32 %s1147_s8, 4  ;;  %s714_s21 = int_to_ptr.vmem [resolvable:$true] %s713_s21 }
  0x57   :  { %843 = vmatpush3.msra.mxu0 %v116_v18  ;;  %878 = vmatpush3.msra.mxu1 %v210_v31  ;;  %s1087_s22 = scalar_lea.vmem %s714_s21, 128  ;;  %p1092_p12 = scmp.lt.s32.totalorder %s714_s21, %s714_s21 }
  0x58   :  { %844 = vmatprep.subr.mxu0 %v1144_v0  ;;  %879 = vmatprep.subr.mxu1 %v1144_v0  ;;  %p1088_p11 = scmp.ne.s32.totalorder %s714_s21, %s1087_s22  ;;  %p1093_p13 = scmp.lt.s32.totalorder %s1087_s22, %s1087_s22 }
  0x59   :  { %845 = vmatpush3.msra.mxu0 %v115_v20  ;;  %880 = vmatpush3.msra.mxu1 %v209_v33 }
  0x5a   :  { %846 = vmatprep.subr.mxu0 %v1144_v0  ;;  %881 = vmatprep.subr.mxu1 %v1144_v0  ;;  %p1094_p0 = por %p1093_p13, %p1092_p12 }
  0x5b   :  { %847 = vmatpush3.msra.mxu0 %v114_v22  ;;  %882 = vmatpush3.msra.mxu1 %v208_v48 }
  0x5c   :  { %848 = vmatprep.subr.mxu0 %v1144_v0  ;;  %883 = vmatprep.subr.mxu1 %v1144_v0  ;;  %p1095_p1 = pnand %p1094_p0, %p1088_p11 }
  0x5d   :  { %849 = vmatpush3.msra.mxu0 %v113_v24  ;;  %884 = vmatpush3.msra.mxu1 %v207_v49 }
  0x5e   :  { %850 = vmatprep.subr.mxu0 %v1144_v0  ;;  %885 = vmatprep.subr.mxu1 %v1144_v0 }
  0x5f   :  { %851 = vmatpush3.msra.mxu0 %v112_v26  ;;  %886 = vmatpush3.msra.mxu1 %v206_v50 }
  0x60   :  { %853 = vmatmul.mubr.f32.vlgmr.msra.gmra.mxu0 %v109_v27  ;;  %890 = vmatprep.subr.mxu0 %v1144_v0 }
  0x61   :  { %891 = vmatpush3.msra.mxu0 %v314_v28  ;;  %922 = vmatprep.mubr.msk.f32.mxu0 %vm1145_vm0, %v1144_v0 }
  0x62   :  { %892 = vmatprep.subr.mxu0 %v1144_v0  ;;  %925 = vmatprep.subr.mxu1 %v1144_v0 }
  0x63   :  { %893 = vmatpush3.msra.mxu0 %v313_v30  ;;  %982 = vset.pattern.permute.xlu0 %v1146_v52 }
  0x64   :  { %894 = vmatprep.subr.mxu0 %v1144_v0  ;;  %696 = vperm.xlu0 %982, %v111_v51  }
  0x65   :  { %895 = vmatpush3.msra.mxu0 %v312_v32 }
  0x66   :  { %896 = vmatprep.subr.mxu0 %v1144_v0 }
  0x67   :  { %897 = vmatpush3.msra.mxu0 %v311_v34 }
  0x68   :  { %898 = vmatprep.subr.mxu0 %v1144_v0 }
  0x69   :  { %899 = vmatpush3.msra.mxu0 %v310_v35 }
  0x6a   :  { %900 = vmatprep.subr.mxu0 %v1144_v0 }
  0x6b   :  { %901 = vmatpush3.msra.mxu0 %v309_v36 }
  0x6c   :  { %902 = vmatprep.subr.mxu0 %v1144_v0 }
  0x6d   :  { %903 = vmatpush3.msra.mxu0 %v308_v37 }
  0x6e   :  { %904 = vmatprep.subr.mxu0 %v1144_v0 }
  0x6f   :  { %905 = vmatpush3.msra.mxu0 %v307_v38 }
  0x70   :  { %906 = vmatprep.subr.mxu0 %v1144_v0 }
  0x71   :  { %907 = vmatpush3.msra.mxu0 %v306_v39 }
  0x72   :  { %908 = vmatprep.subr.mxu0 %v1144_v0 }
  0x73   :  { %909 = vmatpush3.msra.mxu0 %v305_v40 }
  0x74   :  { %910 = vmatprep.subr.mxu0 %v1144_v0 }
  0x75   :  { %911 = vmatpush3.msra.mxu0 %v304_v41 }
  0x76   :  { %912 = vmatprep.subr.mxu0 %v1144_v0 }
  0x77   :  { %913 = vmatpush3.msra.mxu0 %v303_v42 }
  0x78   :  { %914 = vmatprep.subr.mxu0 %v1144_v0 }
  0x79   :  { %915 = vmatpush3.msra.mxu0 %v302_v43 }
  0x7a   :  { %916 = vmatprep.subr.mxu0 %v1144_v0 }
  0x7b   :  { %917 = vmatpush3.msra.mxu0 %v301_v44 }
  0x7c   :  { %918 = vmatprep.subr.mxu0 %v1144_v0 }
  0x7d   :  { %919 = vmatpush3.msra.mxu0 %v300_v45 }
  0x7e   :  { %920 = vmatprep.subr.mxu0 %v1144_v0 }
  0x7f   :  { %921 = vmatpush3.msra.mxu0 %v299_v46 }
  0x80   :  { %923 = vmatmul.mubr.f32.vlgmr.msra.gmra.mxu0 %v110_v47 }
 0x120   :  { %v201_v54 = vpop.f32.mrf.mxu0 }
 0x121   :  { %v202_v55 = vadd.f32 %v740_v53, %v201_v54 }
 0x122   :  { %v854_v56 = vpop.f32.mrf.mxu0 }
 0x123   :  { %v205_v57 = vmax.f32 %v202_v55, 0.0 }
 0x125   :  { %888 = vmatmul.mubr.f32.vlgmr.msra.gmra.mxu1 %v205_v57 }
 0x126   :  { %926 = vmatpush3.msra.mxu1 %v408_v58  ;;  %957 = vmatprep.mubr.msk.f32.mxu1 %vm1145_vm0, %v1144_v0 }
 0x127   :  { %927 = vmatprep.subr.mxu1 %v1144_v0 }
 0x128   :  { %928 = vmatpush3.msra.mxu1 %v407_v59 }
 0x129   :  { %929 = vmatprep.subr.mxu1 %v1144_v0 }
 0x12a   :  { %930 = vmatpush3.msra.mxu1 %v406_v60 }
 0x12b   :  { %931 = vmatprep.subr.mxu1 %v1144_v0 }
 0x12c   :  { %932 = vmatpush3.msra.mxu1 %v405_v61 }
 0x12d   :  { %933 = vmatprep.subr.mxu1 %v1144_v0 }
 0x12e   :  { %934 = vmatpush3.msra.mxu1 %v404_v62 }
 0x12f   :  { %935 = vmatprep.subr.mxu1 %v1144_v0 }
 0x130   :  { %936 = vmatpush3.msra.mxu1 %v403_v63 }
 0x131   :  { %937 = vmatprep.subr.mxu1 %v1144_v0 }
 0x132   :  { %938 = vmatpush3.msra.mxu1 %v402_v1 }
 0x133   :  { %939 = vmatprep.subr.mxu1 %v1144_v0 }
 0x134   :  { %940 = vmatpush3.msra.mxu1 %v401_v2 }
 0x135   :  { %941 = vmatprep.subr.mxu1 %v1144_v0 }
 0x136   :  { %942 = vmatpush3.msra.mxu1 %v400_v3 }
 0x137   :  { %943 = vmatprep.subr.mxu1 %v1144_v0 }
 0x138   :  { %944 = vmatpush3.msra.mxu1 %v399_v4 }
 0x139   :  { %945 = vmatprep.subr.mxu1 %v1144_v0 }
 0x13a   :  { %946 = vmatpush3.msra.mxu1 %v398_v5 }
 0x13b   :  { %947 = vmatprep.subr.mxu1 %v1144_v0 }
 0x13c   :  { %948 = vmatpush3.msra.mxu1 %v397_v6 }
 0x13d   :  { %949 = vmatprep.subr.mxu1 %v1144_v0 }
 0x13e   :  { %950 = vmatpush3.msra.mxu1 %v396_v7 }
 0x13f   :  { %951 = vmatprep.subr.mxu1 %v1144_v0 }
 0x140   :  { %v388_v11 = vpop.f32.mrf.mxu0  ;;  %952 = vmatpush3.msra.mxu1 %v395_v8 }
 0x141   :  { %v389_v12 = vadd.f32 %v742_v9, %v388_v11  ;;  %953 = vmatprep.subr.mxu1 %v1144_v0 }
 0x142   :  { %v924_v14 = vpop.f32.mrf.mxu0  ;;  %954 = vmatpush3.msra.mxu1 %v394_v10 }
 0x143   :  { %v392_v15 = vmax.f32 %v389_v12, 0.0  ;;  %955 = vmatprep.subr.mxu1 %v1144_v0 }
 0x144   :  { %956 = vmatpush3.msra.mxu1 %v393_v13 }
 0x145   :  { %958 = vmatmul.mubr.f32.vlgmr.msra.gmra.mxu1 %v392_v15 }
 0x1e5   :  { %v295_v17 = vpop.f32.mrf.mxu1 }
 0x1e6   :  { %v1339_v18 = vadd.f32 %v741_v16, %v295_v17 }
 0x1e7   :  { %v889_v19 = vpop.f32.mrf.mxu1 }
 0x1e8   :  { %703 = vst [vmem:[#allocation11] sm:$0xff] %v1339_v18 }
 0x1e9   :  { %1098 = shalt.err (!%p1095_p1)
}
 0x1ea   :  { %716 = dma.vmem_to_hbm [thread:$0]  %s714_s21, 128, %s1393_s12, [#allocation4]   ;;  %v743_v0 = vld [vmem:[%s1391_s10] ss:$0 sm:$0xff] }
 0x1eb   :  { %s1148_s25 = smov [#allocation12]  }
 0x1ec   :  { %s723_s26 = sshll.u32 %s1148_s25, 4  ;;  %s724_s26 = int_to_ptr.vmem [resolvable:$true] %s723_s26 }
 0x1ed   :  { %s1107_s27 = scalar_lea.vmem %s724_s26, 128  ;;  %p1112_p3 = scmp.lt.s32.totalorder %s724_s26, %s724_s26 }
 0x1ee   :  { %p1108_p2 = scmp.ne.s32.totalorder %s724_s26, %s1107_s27  ;;  %p1113_p4 = scmp.lt.s32.totalorder %s1107_s27, %s1107_s27 }
 0x1f0   :  { %p1114_p5 = por %p1113_p4, %p1112_p3 }
 0x1f2   :  { %p1115_p6 = pnand %p1114_p5, %p1108_p2 }
 0x205   :  { %v482_v20 = vpop.f32.mrf.mxu1 }
 0x206   :  { %v1348_v21 = vadd.f32 %v743_v0, %v482_v20 }
 0x207   :  { %v959_v22 = vpop.f32.mrf.mxu1 }
 0x208   :  { %v489_v23 = vand.u32 2139095040, %v1348_v21  ;;  %704 = vst [vmem:[#allocation12] sm:$0xff] %v1348_v21 }
 0x209   :  { %1118 = shalt.err (!%p1115_p6)
}
 0x20a   :  { %726 = dma.vmem_to_hbm [thread:$0]  %s724_s26, 128, %s1394_s13, [#allocation13]   ;;  %v490_v24 = vshrl.u32 %v489_v23, 23  ;;  %v486_v27 = vand.u32 2147483647, %v1348_v21  ;;  %vm488_vm8 = vcmp.lt.s32.totalorder %v1348_v21, 0  ;;  %vm578_vm0 = vweird.f32 %v1348_v21 }
 0x20b   :  { %v1149_v33 = vmov 683565275   ;;  %v1150_v35 = vmov 2475754826   ;;  %v1151_v38 = vmov 2131351028  }
 0x20c   :  { %v744_v25 = vadd.s32 4294967169, %v490_v24  ;;  %v493_v31 = vand.u32 8388607, %v486_v27  ;;  %v1152_v41 = vmov 2102212464  }
 0x20d   :  { %v1153_v44 = vmov 920167782   ;;  %v1154_v47 = vmov 1326507024   ;;  %vm487_vm9 = vcmp.le.f32.partialorder %v486_v27, 0.7853982 }
 0x20e   :  { %v496_v26 = vadd.s32 1, %v744_v25  ;;  %v494_v49 = vor.u32 8388608, %v493_v31 }
 0x210   :  { %vm497_vm1 = vcmp.gt.s32.totalorder %v496_v26, 0  ;;  %v534_v63 = vshll.u32 %v494_v49, 8 }
 0x211   :  { %v498_v28 = vsel %vm497_vm1, %v496_v26, 0 }
 0x212   :  { %v500_v29 = vand.u32 31, %v498_v28  ;;  %v499_v32 = vshrl.u32 %v498_v28, 5 }
 0x214   :  { %v501_v30 = vsub.s32 32, %v500_v29  ;;  %v503_v34 = vshll.u32 %v1149_v33, %v500_v29  ;;  %v506_v36 = vshll.u32 %v1150_v35, %v500_v29  ;;  %v509_v40 = vshll.u32 %v1151_v38, %v500_v29 }
 0x215   :  { %v512_v43 = vshll.u32 %v1152_v41, %v500_v29  ;;  %v515_v46 = vshll.u32 %v1153_v44, %v500_v29  ;;  %vm518_vm2 = vcmp.lt.s32.totalorder %v499_v32, 1  ;;  %vm521_vm3 = vcmp.lt.s32.totalorder %v499_v32, 4 }
 0x216   :  { %v504_v37 = vshrl.u32 %v1150_v35, %v501_v30  ;;  %v507_v39 = vshrl.u32 %v1151_v38, %v501_v30  ;;  %v510_v42 = vshrl.u32 %v1152_v41, %v501_v30  ;;  %v513_v45 = vshrl.u32 %v1153_v44, %v501_v30 }
 0x217   :  { %v516_v48 = vshrl.u32 %v1154_v47, %v501_v30  ;;  %v502_v58 = vshrl.u32 %v1149_v33, %v501_v30  ;;  %vm520_vm4 = vcmp.lt.s32.totalorder %v499_v32, 3  ;;  %vm519_vm5 = vcmp.lt.s32.totalorder %v499_v32, 2 }
 0x218   :  { %v505_v50 = vor.u32 %v504_v37, %v503_v34  ;;  %v508_v51 = vor.u32 %v507_v39, %v506_v36  ;;  %v511_v52 = vor.u32 %v510_v42, %v509_v40  ;;  %v514_v53 = vor.u32 %v513_v45, %v512_v43 }
 0x219   :  { %v517_v54 = vor.u32 %v516_v48, %v515_v46 }
 0x21a   :  { %v523_v55 = vsel %vm521_vm3, %v511_v52, 2102212464  ;;  %v526_v56 = vsel %vm518_vm2, %v505_v50, %v508_v51  ;;  %v530_v57 = vsel %vm518_vm2, %v508_v51, %v511_v52  ;;  %v527_v59 = vsel %vm521_vm3, %v514_v53, 920167782 }
 0x21b   :  { %v531_v60 = vsel %vm521_vm3, %v517_v54, 1326507024  ;;  %v528_v61 = vsel %vm520_vm4, %v511_v52, %v527_v59  ;;  %v522_v1 = vsel %vm518_vm2, %v502_v58, %v505_v50  ;;  %v524_v2 = vsel %vm520_vm4, %v508_v51, %v523_v55  ;;  %v697_v51 = vpop.permute.xlu0 %696 }
 0x21c   :  { %v532_v62 = vsel %vm520_vm4, %v514_v53, %v531_v60  ;;  %v529_v3 = vsel %vm519_vm5, %v526_v56, %v528_v61  ;;  %v525_v9 = vsel %vm519_vm5, %v522_v1, %v524_v2 }
 0x21d   :  { %v533_v4 = vsel %vm519_vm5, %v530_v57, %v532_v62  ;;  %v1361_v7 = vmul.u32.u64.low %v534_v63, %v529_v3  ;;  %v1362_v8 = vmul.u32.u64.high %v534_v63, %v529_v3, %v1361_v7  ;;  %v541_v11 = vmul.u32 %v534_v63, %v525_v9 }
 0x21e   :  { %v1358_v5 = vmul.u32.u64.low %v534_v63, %v533_v4  ;;  %v1359_v6 = vmul.u32.u64.high %v534_v63, %v533_v4, %v1358_v5 }
 0x21f   :  { %v544_v10 = vadd.s32 1, %v1362_v8 }
 0x220   :  { %vm543_vm6 = vc.u32 %v1359_v6, %v1361_v7  ;;  %v542_v24 = vadd.s32 %v1361_v7, %v1359_v6 }
 0x221   :  { %v545_v12 = vsel %vm543_vm6, %v544_v10, %v1362_v8 }
 0x222   :  { %v546_v13 = vadd.s32 %v545_v12, %v541_v11 }
 0x224   :  { %v547_v14 = vadd.s32 536870912, %v546_v13 }
 0x226   :  { %v548_v15 = vshrl.u32 %v547_v14, 30 }
 0x228   :  { %v549_v16 = vshll.u32 %v548_v15, 30  ;;  %v572_v38 = vsub.s32 4, %v548_v15 }
 0x22a   :  { %v550_v17 = vsub.s32 %v546_v13, %v549_v16  ;;  %v573_v41 = vsel %vm488_vm8, %v572_v38, %v548_v15 }
 0x22b   :  { %v575_v42 = vsel %vm487_vm9, 0, %v573_v41 }
 0x22c   :  { %v552_v19 = vsub.s32 0, %v550_v17  ;;  %v683_v43 = vadd.s32 3, %v575_v42  ;;  %v579_v44 = vand.u32 3, %v575_v42 }
 0x22e   :  { %v745_v0 = vmin.u32 %v552_v19, %v550_v17  ;;  %v684_v45 = vand.u32 3, %v683_v43  ;;  %vm584_vm10 = vcmp.eq.s32.totalorder %v579_v44, 2  ;;  %vm581_vm12 = vcmp.eq.s32.totalorder %v579_v44, 0 }
 0x22f   :  { %vm580_vm14 = vcmp.lt.s32.totalorder %v579_v44, 2 }
 0x230   :  { %v554_v20 = vclz %v745_v0  ;;  %vm689_vm11 = vcmp.eq.s32.totalorder %v684_v45, 2  ;;  %vm686_vm13 = vcmp.eq.s32.totalorder %v684_v45, 0  ;;  %vm685_vm15 = vcmp.lt.s32.totalorder %v684_v45, 2 }
 0x232   :  { %v746_v22 = vadd.s32 4294967294, %v554_v20 }
 0x234   :  { %vm747_vm7 = vcmp.lt.s32.totalorder %v746_v22, 0 }
 0x235   :  { %v557_v23 = vsel %vm747_vm7, 0, %v746_v22 }
 0x236   :  { %v558_v25 = vsub.s32 32, %v557_v23  ;;  %v562_v26 = vsub.s32 4294967266, %v557_v23  ;;  %v559_v28 = vshll.u32 %v550_v17, %v557_v23 }
 0x238   :  { %v560_v29 = vshrl.u32 %v542_v24, %v558_v25  ;;  %v563_v30 = vadd.s32 127, %v562_v26 }
 0x23a   :  { %v561_v31 = vor.u32 %v560_v29, %v559_v28  ;;  %v564_v32 = vshll.u32 %v563_v30, 23 }
 0x23c   :  { %v565_v33 = vor.u32 4788187, %v564_v32  ;;  %v568_v35 = vcvt.s32.f32 %v561_v31 }
 0x23e   :  { %v566_v34 = vand.u32 2147483647, %v565_v33 }
 0x240   :  { %v569_v36 = vmul.f32 %v568_v35, %v566_v34 }
 0x242   :  { %v570_v37 = vxor.u32 2147483648, %v569_v36 }
 0x244   :  { %v571_v39 = vsel %vm488_vm8, %v570_v37, %v569_v36 }
 0x245   :  { %v574_v40 = vsel %vm487_vm9, %v1348_v21, %v571_v39 }
 0x246   :  { %983 = vcosq.f32 %v574_v40 }
 0x247   :  { %985 = vsinq.f32 %v574_v40 }
 0x253   :  { %v984_v46 = vpop.eup %983 }
 0x254   :  { %v986_v47 = vpop.eup %985  ;;  %v585_v48 = vxor.u32 2147483648, %v984_v46 }
 0x255   :  { %v582_v49 = vxor.u32 2147483648, %v986_v47 }
 0x256   :  { %v586_v50 = vsel %vm584_vm10, %v585_v48, %v986_v47  ;;  %v691_v27 = vsel %vm689_vm11, %v585_v48, %v986_v47 }
 0x257   :  { %v583_v52 = vsel %vm581_vm12, %v984_v46, %v582_v49  ;;  %v688_v53 = vsel %vm686_vm13, %v984_v46, %v582_v49 }
 0x258   :  { %v587_v54 = vsel %vm580_vm14, %v583_v52, %v586_v50  ;;  %v692_v55 = vsel %vm685_vm15, %v688_v53, %v691_v27 }
 0x259   :  { %v588_v56 = vsel %vm578_vm0, nan, %v587_v54  ;;  %v693_v57 = vsel %vm578_vm0, nan, %v692_v55 }
 0x25a   :  { %v589_v58 = vmul.f32 %v588_v56, %v1339_v18  ;;  %v699_v59 = vmul.f32 %v697_v51, %v693_v57 }
 0x25c   :  { %v700_v60 = vmul.f32 %v699_v59, %v1339_v18  ;;  %701 = vst [vmem:[%s1392_s11] sm:$0xff] %v589_v58 }
 0x25e   :  { %702 = vst [vmem:[%s1392_s11 + $0x8] sm:$0xff] %v700_v60 }
 0x25f   :  { %1133 = dma.done.wait [#allocation4], 128  }
 0x260   :  { %1134 = vsyncadd [#allocation4], 4294967168 }
 0x261   :  { %1135 = dma.done.wait [#allocation13], 128  }
 0x262   :  { %1136 = vsyncadd [#allocation13], 4294967168 }
 0x263   :  { %735 = vsyncpa [#allocation3], 1 }
 0x264   :  { %736 = vsyncpa [#allocation6], 1 }
 0x265   :  { %737 = vsyncpa [#allocation9], 1 }
 0x266   :  { %738 = vsyncpa [#allocation4], 1 }
 0x267   :  { %739 = vsyncpa [#allocation13], 1 }

</bundles_post_ra>
